<compile_context>
chip_gen: v6e
topology: v6e:2x2x1
jax: 0.10.0
libtpu: 0.0.40
codegen_flags: <defaults>
</compile_context>

<pallas_src>
import numpy as np
import jax
import jax.numpy as jnp
from jax.experimental import pallas as pl
from jax.experimental.pallas import tpu as pltpu


# ---------------------------------------------------------------------------
# Kernel
# ---------------------------------------------------------------------------
def pe_add_kernel(x_ref, pe_ref, o_ref):
    """x_ref: (bb, C, S); pe_ref: (S_blk, C) with S_blk >= S; o_ref: (bb, C, S)."""
    S = x_ref.shape[2]
    pe_rows = pe_ref[0:S, :].astype(x_ref.dtype)   # (S, C) static slice of the VMEM tile
    pe_t = pe_rows.T                               # (C, S) one small in-kernel transpose
    o_ref[...] = x_ref[...] + pe_t[None, :, :]     # broadcast over the batch block


# ---------------------------------------------------------------------------
# Wrapper
# ---------------------------------------------------------------------------
def _round_up(n, m):
    return ((n + m - 1) // m) * m


def _pick_batch_block(B, C, S, itemsize, vmem_budget_bytes=8 * 1024 * 1024):
    # 2-way batch split so both v7x TensorCores get work; single block if B == 1.
    bb = pl.cdiv(B, 2) if B > 1 else 1
    # Shrink further only if a (double-buffered in + out) block would blow the budget.
    while bb > 1 and 4 * bb * C * S * itemsize > vmem_budget_bytes:
        bb = pl.cdiv(bb, 2)
    return bb


def learned_positional_encoding_forward(x, pe_weight, position_ids=None):
    """x: (B, C, S) float;  pe_weight: (max_position_embeddings, C) (nn.Embedding.weight).

    Returns (B, C, S) = x + pe_weight[position_ids].T (broadcast over batch)."""
    B, C, S = x.shape

    if position_ids is None:
        pe_table = pe_weight                       # kernel uses rows [0:S) only
    else:
        # TODO(synk): move this gather into the kernel (scalar-prefetched ids).
        pe_table = jnp.take(pe_weight, position_ids[0].astype(jnp.int32), axis=0)  # (S, C)

    P = pe_table.shape[0]
    # Only DMA the embedding rows actually needed.  Second-to-last block dim must be a
    # multiple of 8 (sublane) or the full extent; last dim C equals the full extent.
    s_blk = _round_up(S, 8)
    if s_blk > P:
        s_blk = P                                  # fall back to the full table

    bb = _pick_batch_block(B, C, S, x.dtype.itemsize)
    grid = (pl.cdiv(B, bb),)

    return pl.pallas_call(
        pe_add_kernel,
        out_shape=jax.ShapeDtypeStruct((B, C, S), x.dtype),
        grid=grid,
        in_specs=[
            pl.BlockSpec((bb, C, S), lambda i: (i, 0, 0)),
            # Same block index for every grid step -> the PE tile stays resident in VMEM.
            pl.BlockSpec((s_blk, C), lambda i: (0, 0)),
        ],
        out_specs=pl.BlockSpec((bb, C, S), lambda i: (i, 0, 0)),
        compiler_params=pltpu.CompilerParams(
            dimension_semantics=("parallel",),
            vmem_limit_bytes=64 * 1024 * 1024,
        ),
    )(x, pe_table)


# ---------------------------------------------------------------------------
# Pure-jnp reference (mirrors the PyTorch forward exactly)
# ---------------------------------------------------------------------------
def ref_forward(x, pe_weight, position_ids=None):
    S = x.shape[2]
    if position_ids is None:
        ids = jnp.arange(S)
    else:
        ids = position_ids[0]
    rows = pe_weight[ids]                                  # (S, C)
    return jnp.transpose(rows, (1, 0))[None, :, :] + x     # (1, C, S) + (B, C, S)


# ---------------------------------------------------------------------------
# Self-test
# ---------------------------------------------------------------------------
if __name__ == "__main__":
    B, C, S = 2, 32, 16            # batch, embedding_dim, sequence positions (x.size(2))
    MAX_POS = 64                   # max_position_embeddings

    key = jax.random.PRNGKey(0)
    kx, kw = jax.random.split(key)
    x = jax.random.normal(kx, (B, C, S), jnp.float32)
    pe_weight = jax.random.normal(kw, (MAX_POS, C), jnp.float32)   # nn.Embedding.weight

    # Default path (position_ids=None), as used by the module.
    out = learned_positional_encoding_forward(x, pe_weight)
    out = jax.block_until_ready(out)
    assert out.shape == (B, C, S)
    np.testing.assert_allclose(np.asarray(out),
                               np.asarray(ref_forward(x, pe_weight)),
                               rtol=1e-6, atol=1e-6)

    # Explicit position_ids path (reversed positions) — same semantics as pe(position_ids).
    pos_ids = jnp.arange(S - 1, -1, -1, dtype=jnp.int32)[None, :]
    out2 = learned_positional_encoding_forward(x, pe_weight, position_ids=pos_ids)
    out2 = jax.block_until_ready(out2)
    np.testing.assert_allclose(np.asarray(out2),
                               np.asarray(ref_forward(x, pe_weight, pos_ids)),
                               rtol=1e-6, atol=1e-6)

    print("KERNEL_OK")
</pallas_src>

<mosaic_0001>
module attributes {stable_mosaic.version = 11 : i64} {
  func.func @pe_add_kernel(%arg0: i32, %arg1: memref<1x32x16xf32, #tpu.memory_space<vmem>>, %arg2: memref<16x32xf32, #tpu.memory_space<vmem>>, %arg3: memref<1x32x16xf32, #tpu.memory_space<vmem>>) attributes {dimension_semantics = [#tpu.dimension_semantics<parallel>], iteration_bounds = array<i64: 2>, scalar_prefetch = 0 : i64, scratch_operands = 0 : i64, tpu.core_type = #tpu.core_type<tc>, window_params = [{transform_indices = @transform_0, window_bounds = array<i64: 1, 32, 16>}, {transform_indices = @transform_1, window_bounds = array<i64: 16, 32>}, {transform_indices = @transform_2, window_bounds = array<i64: 1, 32, 16>}]} {
    %c0 = arith.constant 0 : index
    %c0_0 = arith.constant 0 : index
    %0 = vector.load %arg2[%c0, %c0_0] : memref<16x32xf32, #tpu.memory_space<vmem>>, vector<16x32xf32>
    %1 = tpu.transpose %0, [1, 0] : vector<16x32xf32> -> vector<32x16xf32>
    %c0_1 = arith.constant 0 : index
    %c0_2 = arith.constant 0 : index
    %c0_3 = arith.constant 0 : index
    %2 = vector.load %arg1[%c0_1, %c0_2, %c0_3] : memref<1x32x16xf32, #tpu.memory_space<vmem>>, vector<1x32x16xf32>
    %3 = vector.shape_cast %1 : vector<32x16xf32> to vector<1x32x16xf32>
    %4 = arith.addf %2, %3 : vector<1x32x16xf32>
    %c0_4 = arith.constant 0 : index
    %c0_5 = arith.constant 0 : index
    %c0_6 = arith.constant 0 : index
    %5 = vector.load %arg3[%c0_4, %c0_5, %c0_6] : memref<1x32x16xf32, #tpu.memory_space<vmem>>, vector<1x32x16xf32>
    tpu.vector_store %arg3[%c0_4, %c0_5, %c0_6], %4 {strides = array<i32>} : memref<1x32x16xf32, #tpu.memory_space<vmem>>, vector<1x32x16xf32>,
    return
  }
  func.func @transform_0(%arg0: i32) -> (i32, i32, i32) {
    %c0_i32 = arith.constant 0 : i32
    %c0_i32_0 = arith.constant 0 : i32
    %c0_i32_1 = arith.constant 0 : i32
    return %arg0, %c0_i32, %c0_i32_0 : i32, i32, i32
  }
  func.func @transform_1(%arg0: i32) -> (i32, i32) {
    %c0_i32 = arith.constant 0 : i32
    %c0_i32_0 = arith.constant 0 : i32
    %c0_i32_1 = arith.constant 0 : i32
    return %c0_i32, %c0_i32_0 : i32, i32
  }
  func.func @transform_2(%arg0: i32) -> (i32, i32, i32) {
    %c0_i32 = arith.constant 0 : i32
    %c0_i32_0 = arith.constant 0 : i32
    %c0_i32_1 = arith.constant 0 : i32
    return %arg0, %c0_i32, %c0_i32_0 : i32, i32, i32
  }
}

</mosaic_0001>

<bundles_post_ra>
// kernel: tpu_custom_call.1
= control target key start
LH: loop header
LB: loop body
LE: loop exit
PB: predicated region body
PF: predicated region fallthrough
CT: control target
= control target key end

     0   :  { %s291_s9 = smov 0   ;;  %s318_s0 = inlined_call_operand.vmem [shape: f32[2,32,16], index: 0, kind: input, shape index: {}]   ;;  %s319_s1 = inlined_call_operand.vmem [shape: f32[64,32], index: 1, kind: input, shape index: {}]   ;;  %s320_s2 = inlined_call_operand.vmem [shape: f32[2,32,16], index: 2, kind: output, shape index: {}]  }
   0x1 LB: > { %s246_s10 = sadd.s32 4294967295, %s274_s9   ;;  %p250_p0 = scmp.ge.s32.totalorder %s274_s9, 1  ;;  %s274_s9 = sphi %s291_s9, %s12_s9  }
   0x2   : > { %p112_p1 = scmp.lt.s32.totalorder %s274_s9, 3 }
   0x4   : > { %p113_p2 = pnand %p250_p0, %p112_p1 }
   0x5   : > { %p134_p3 = scmp.lt.s32.totalorder (!%p113_p2), %s246_s10, 1 }
   0x6   : > { %116 = sbr.rel (%p113_p2) target bundleno = 152 (0x98), region = 28 }
   0xb   : > { %v144_v0 = vld [vmem:[%s319_s1] sm:$0xff]  ;;  %v145_v1 = vld [vmem:[%s319_s1 + $0x8] sm:$0xff]  ;;  %s322_s10 = smov (!%p134_p3, %s246_s10), 1  ;;  %vm186_vm0 = vcmask 130048  }
   0xc   : > { %146 = vxpose.xlu0.b32.start [1/2] (short) (narrow) %v144_v0, 32  ;;  %s257_s15 = sshll.u32 %s322_s10, 5 }
   0xd   : > { %s138_s18 = scalar_lea.vmem %s318_s0, %s257_s15  ;;  %s143_s21 = scalar_lea.vmem %s320_s2, %s257_s15 }
   0xe   : > { %v178_v2 = vld [vmem:[%s138_s18] sm:$0xff]  ;;  %v179_v5 = vld [vmem:[%s138_s18 + $0x8] sm:$0xff]  ;;  %v180_v8 = vld [vmem:[%s138_s18 + $0x10] sm:$0xff] }
   0xf   : > { %v181_v11 = vld [vmem:[%s138_s18 + $0x18] sm:$0xff] }
  0x10   : > { %147 = vxpose.xlu0.b32.end [2/2] (short) (narrow) %v145_v1, 32 }
  0x88   : > { %v162_v3 = vpop.trf.xlu0 }
  0x89   : > { %v182_v4 = vadd.f32 %v178_v2, %v162_v3 }
  0x8b   : > { %187 = vst.msk [vmem:[%s143_s21] sm:$0xff] %vm186_vm0, %v182_v4 }
  0x8c   : > { %v163_v6 = vpop.trf.xlu0 }
  0x8d   : > { %v183_v7 = vadd.f32 %v179_v5, %v163_v6 }
  0x8f   : > { %188 = vst.msk [vmem:[%s143_s21 + $0x8] sm:$0xff] %vm186_vm0, %v183_v7 }
  0x90   : > { %v164_v9 = vpop.trf.xlu0 }
  0x91   : > { %v184_v10 = vadd.f32 %v180_v8, %v164_v9 }
  0x93   : > { %189 = vst.msk [vmem:[%s143_s21 + $0x10] sm:$0xff] %vm186_vm0, %v184_v10 }
  0x94   : > { %v165_v12 = vpop.trf.xlu0 }
  0x95   : > { %v185_v13 = vadd.f32 %v181_v11, %v165_v12 }
  0x97   : > { %190 = vst.msk [vmem:[%s143_s21 + $0x18] sm:$0xff] %vm186_vm0, %v185_v13 }
  0x98 PF: > { %s12_s9 = sadd.s32 1, %s274_s9  }
  0x99   : > { %p9_p4 = scmp.ge.s32.totalorder %s12_s9, 4  }
  0x9b   :  { %11 = sbr.rel (!%p9_p4) target bundleno = 1 (0x1), region = 58 }

</bundles_post_ra>
